<compile_context>
chip_gen: v5e
topology: v5e:2x2
jax: 0.10.0
libtpu: 0.0.40
codegen_flags: <defaults>
</compile_context>

<pallas_src>
import jax
import jax.numpy as jnp
from jax.experimental import pallas as pl
from jax.experimental.pallas import tpu as pltpu


def apc_ensembler_kernel(x_ref, w_ref, b_ref, logits_ref):
    """Single fused GEMM: logits = x @ W_fused + b_fused (f32 MXU accumulation)."""
    logits_ref[...] = jnp.dot(x_ref[...], w_ref[...],
                              preferred_element_type=jnp.float32) + b_ref[...]


def _round_up(n, m):
    return ((n + m - 1) // m) * m


def apc_ensembler_forward(x, head_w, head_b, dense_w, dense_b, losses,
                          *, block_b=512):
    """x: (B, H) f32; head_w: (n, H, D); head_b: (n, 1, D);
    dense_w: (D_out, n*D)  (PyTorch nn.Linear layout); dense_b: (D_out,);
    losses: (1, n).  Returns {'logits': (B, D_out) f32, 'loss': scalar f32}."""
    B, H = x.shape
    n_models, _, D = head_w.shape
    d_out = dense_w.shape[0]

    # --- wrapper-side fusion (computed once, f32, tiny XLA ops) -------------
    # cat-ensemble heads as one wide weight: (H, n*D), order == torch.cat(dim=-1)
    wh_all = jnp.transpose(head_w, (1, 0, 2)).reshape(H, n_models * D)
    bh_all = head_b.reshape(1, n_models * D)
    # fold the ensembler's nn.Linear(n*D, D_out) into the heads:
    #   logits = (x @ Wh_all + bh_all) @ Wd^T + bd
    #          =  x @ (Wh_all @ Wd^T)  + (bh_all @ Wd^T + bd)
    w_fused = wh_all @ dense_w.T                                   # (H, D_out)
    b_fused = bh_all @ dense_w.T + dense_b.reshape(1, d_out)       # (1, D_out)

    # --- lane-dense padding of the output axis to 128 lanes -----------------
    LANE = 128
    d_pad = _round_up(d_out, LANE)
    w_fused = jnp.pad(w_fused, ((0, 0), (0, d_pad - d_out))).astype(jnp.float32)
    b_fused = jnp.pad(b_fused, ((0, 0), (0, d_pad - d_out))).astype(jnp.float32)

    # --- batch tiling: sublane-aligned, >=2 grid steps when B allows --------
    tb = max(8, min(block_b, _round_up(pl.cdiv(B, 2), 8)))
    b_pad = _round_up(B, tb)
    x_p = x if b_pad == B else jnp.pad(x, ((0, b_pad - B), (0, 0)))
    grid = (b_pad // tb,)

    # --- explicit VMEM budget (double-buffered x & out tiles + weights) -----
    need = (2 * tb * H + 2 * tb * d_pad + 2 * H * d_pad + 2 * d_pad) * 4
    vmem_limit = int(min(32 * 1024 * 1024, max(4 * 1024 * 1024, 2 * need)))

    logits_pad = pl.pallas_call(
        apc_ensembler_kernel,
        grid=grid,
        in_specs=[
            pl.BlockSpec((tb, H), lambda i: (i, 0)),      # x: batch-tiled
            pl.BlockSpec((H, d_pad), lambda i: (0, 0)),   # fused weight, resident
            pl.BlockSpec((1, d_pad), lambda i: (0, 0)),   # fused bias, resident
        ],
        out_specs=pl.BlockSpec((tb, d_pad), lambda i: (i, 0)),
        out_shape=jax.ShapeDtypeStruct((b_pad, d_pad), jnp.float32),
        compiler_params=pltpu.CompilerParams(
            dimension_semantics=("parallel",),
            vmem_limit_bytes=vmem_limit),
    )(x_p, w_fused, b_fused)

    logits = logits_pad[:B, :d_out]
    # loss = sum of sub-model losses: trivial scalar reduction kept in plain JAX.
    loss = jnp.sum(losses)
    return {"logits": logits, "loss": loss}


if __name__ == "__main__":
    # Small shapes consistent with APC: batch=8, hidden=32, output_dim=3, 2 models.
    B, H, D, N_MODELS = 8, 32, 3, 2

    key = jax.random.PRNGKey(0)
    ks = jax.random.split(key, 6)
    x = jax.random.normal(ks[0], (B, H), jnp.float32)
    head_w = jax.random.normal(ks[1], (N_MODELS, H, D), jnp.float32) * 0.1
    head_b = jax.random.normal(ks[2], (N_MODELS, 1, D), jnp.float32) * 0.1
    # nn.Linear(output_dim * n_models, output_dim): weight (D, D*n), bias (D,)
    dense_w = jax.random.normal(ks[3], (D, D * N_MODELS), jnp.float32) * 0.1
    dense_b = jax.random.normal(ks[4], (D,), jnp.float32) * 0.1
    # per-sub-model losses (scalars); the ensembler just sums them
    losses = jnp.abs(jax.random.normal(ks[5], (1, N_MODELS), jnp.float32))

    out = apc_ensembler_forward(x, head_w, head_b, dense_w, dense_b, losses)
    jax.block_until_ready(out["logits"])
    jax.block_until_ready(out["loss"])

    # pure-JAX (f32) reference of the exact PyTorch semantics
    sub_logits = [x @ head_w[i] + head_b[i] for i in range(N_MODELS)]
    cat = jnp.concatenate(sub_logits, axis=-1)          # torch.cat(..., dim=-1)
    ref_logits = cat @ dense_w.T + dense_b              # self.dense(logits)
    ref_loss = losses.sum()                             # sum of sub-model losses

    # f32 compute end-to-end; only difference is matmul associativity of the
    # wrapper-side weight fusion -> tight tolerance.
    assert out["logits"].shape == ref_logits.shape
    assert jnp.allclose(out["logits"], ref_logits, atol=1e-4, rtol=1e-4)
    assert jnp.allclose(out["loss"], ref_loss, atol=1e-5, rtol=1e-5)
    print("KERNEL_OK")
</pallas_src>

<mosaic_0001>
module attributes {stable_mosaic.version = 11 : i64} {
  func.func @apc_ensembler_kernel(%arg0: i32, %arg1: memref<8x32xf32, #tpu.memory_space<vmem>>, %arg2: memref<32x128xf32, #tpu.memory_space<vmem>>, %arg3: memref<1x128xf32, #tpu.memory_space<vmem>>, %arg4: memref<8x128xf32, #tpu.memory_space<vmem>>) attributes {dimension_semantics = [#tpu.dimension_semantics<parallel>], iteration_bounds = array<i64: 1>, scalar_prefetch = 0 : i64, scratch_operands = 0 : i64, tpu.core_type = #tpu.core_type<tc>, window_params = [{transform_indices = @transform_0, window_bounds = array<i64: 8, 32>}, {pipeline_mode = #tpu.pipeline_mode<synchronous>, transform_indices = @transform_1, window_bounds = array<i64: 32, 128>}, {pipeline_mode = #tpu.pipeline_mode<synchronous>, transform_indices = @transform_2, window_bounds = array<i64: 1, 128>}, {transform_indices = @transform_3, window_bounds = array<i64: 8, 128>}]} {
    %c0 = arith.constant 0 : index
    %c0_0 = arith.constant 0 : index
    %0 = vector.load %arg1[%c0, %c0_0] : memref<8x32xf32, #tpu.memory_space<vmem>>, vector<8x32xf32>
    %c0_1 = arith.constant 0 : index
    %c0_2 = arith.constant 0 : index
    %1 = vector.load %arg2[%c0_1, %c0_2] : memref<32x128xf32, #tpu.memory_space<vmem>>, vector<32x128xf32>
    %cst = arith.constant dense<0.000000e+00> : vector<8x128xf32>
    %2 = tpu.matmul %0, %1, %cst {dimension_numbers = #tpu.dot_dimension_numbers<[1], [0], [0], [1], [0, 0, 1, 1], [], []>} : vector<8x32xf32>, vector<32x128xf32>, vector<8x128xf32> -> vector<8x128xf32>
    %c0_3 = arith.constant 0 : index
    %c0_4 = arith.constant 0 : index
    %3 = vector.load %arg3[%c0_3, %c0_4] : memref<1x128xf32, #tpu.memory_space<vmem>>, vector<1x128xf32>
    %4 = vector.broadcast %3 : vector<1x128xf32> to vector<8x128xf32>
    %5 = arith.addf %2, %4 : vector<8x128xf32>
    %c0_5 = arith.constant 0 : index
    %c0_6 = arith.constant 0 : index
    %6 = vector.load %arg4[%c0_5, %c0_6] : memref<8x128xf32, #tpu.memory_space<vmem>>, vector<8x128xf32>
    tpu.vector_store %arg4[%c0_5, %c0_6], %5 {strides = array<i32>} : memref<8x128xf32, #tpu.memory_space<vmem>>, vector<8x128xf32>,
    return
  }
  func.func @transform_0(%arg0: i32) -> (i32, i32) {
    %c0_i32 = arith.constant 0 : i32
    %c0_i32_0 = arith.constant 0 : i32
    return %arg0, %c0_i32 : i32, i32
  }
  func.func @transform_1(%arg0: i32) -> (i32, i32) {
    %c0_i32 = arith.constant 0 : i32
    %c0_i32_0 = arith.constant 0 : i32
    %c0_i32_1 = arith.constant 0 : i32
    return %c0_i32, %c0_i32_0 : i32, i32
  }
  func.func @transform_2(%arg0: i32) -> (i32, i32) {
    %c0_i32 = arith.constant 0 : i32
    %c0_i32_0 = arith.constant 0 : i32
    %c0_i32_1 = arith.constant 0 : i32
    return %c0_i32, %c0_i32_0 : i32, i32
  }
  func.func @transform_3(%arg0: i32) -> (i32, i32) {
    %c0_i32 = arith.constant 0 : i32
    %c0_i32_0 = arith.constant 0 : i32
    return %arg0, %c0_i32 : i32, i32
  }
}

</mosaic_0001>

<bundles_post_ra>
// kernel: tpu_custom_call.1
= control target key start
LH: loop header
LB: loop body
LE: loop exit
PB: predicated region body
PF: predicated region fallthrough
CT: control target
= control target key end

     0   :  { %8 = vsyncpa [#allocation3], 0  ;;  %s219_s0 = inlined_call_operand.hbm [shape: f32[8,32], index: 0, kind: input, shape index: {}]   ;;  %s220_s1 = inlined_call_operand.hbm [shape: f32[32,128], index: 1, kind: input, shape index: {}]   ;;  %s221_s2 = inlined_call_operand.vmem [shape: f32[1,128], index: 2, kind: input, shape index: {}]   ;;  %s222_s3 = inlined_call_operand.hbm [shape: f32[8,128], index: 3, kind: output, shape index: {}]  }
   0x1   :  { %9 = vsyncpa [#allocation6], 0 }
   0x2   :  { %10 = vsyncpa [#allocation4], 0  ;;  %s16_s14 = sshll.u32 %s219_s0, 4  ;;  %s182_s15 = smov [#allocation2]   ;;  %s17_s14 = int_to_ptr.hbm [resolvable:$true] %s16_s14 }
   0x3   :  { %s18_s16 = sshll.u32 %s182_s15, 4  ;;  %s26_s19 = sshll.u32 %s220_s1, 4  ;;  %s19_s16 = int_to_ptr.vmem [resolvable:$true] %s18_s16  ;;  %s27_s19 = int_to_ptr.hbm [resolvable:$true] %s26_s19 }
   0x4   :  { %21 = dma.hbm_to_vmem [thread:$0]  %s17_s14, 128, %s19_s16, [#allocation3]  }
   0x5   :  { %s183_s20 = smov [#allocation5]   ;;  %s184_s22 = smov 128  }
   0x6   :  { %s28_s21 = sshll.u32 %s183_s20, 4  ;;  %s185_s23 = smov 8   ;;  %s29_s21 = int_to_ptr.vmem [resolvable:$true] %s28_s21 }
   0x7   :  { %34 = dma.hbm_to_vmem [thread:$0]  %s27_s19, 512, %s29_s21, [#allocation6], %s184_s22, %s184_s22, %s185_s23  }
   0x8   :  { %176 = dma.done.wait [#allocation3], 128  }
   0x9   :  { %177 = vsyncadd [#allocation3], 4294967168 }
   0xa   :  { %178 = dma.done.wait [#allocation6], 512  }
   0xb   :  { %179 = vsyncadd [#allocation6], 4294966784  ;;  %v49_v0 = vld [vmem:[#allocation5 + $0x18] sm:$0xff]  ;;  %v48_v1 = vld [vmem:[#allocation5 + $0x10] sm:$0xff]  ;;  %vm54_vm0 = vcmask 261120   ;;  %s186_s24 = smov [#allocation7]  }
   0xc   :  { %70 = vmatpush.msra.mxu0 %v49_v0  ;;  %v47_v2 = vld [vmem:[#allocation5 + $0x8] sm:$0xff]  ;;  %v46_v3 = vld [vmem:[#allocation5] sm:$0xff]  ;;  %v45_v4 = vld [vmem:[#allocation2] sm:$0xff]  ;;  %s84_s25 = sshll.u32 %s186_s24, 4  ;;  %s86_s28 = sshll.u32 %s222_s3, 4  ;;  %s85_s25 = int_to_ptr.vmem [resolvable:$true] %s84_s25  ;;  %s87_s28 = int_to_ptr.hbm [resolvable:$true] %s86_s28 }
   0xd   :  { %v103_v5 = vld [vmem:[%s221_s2] ss:$0 sm:$0xff] }
   0xe   :  { %71 = vmatpush.msra.mxu0 %v48_v1 }
  0x10   :  { %72 = vmatpush.msra.mxu0 %v47_v2 }
  0x12   :  { %73 = vmatpush.msra.mxu0 %v46_v3 }
  0x13   :  { %97 = vmatmul.msk.f32.vlgmr.msra.gmra.mxu0 %vm54_vm0, %v45_v4 }
  0x90   :  { %v75_v6 = vpop.f32.mrf.mxu0 }
  0x91   :  { %v76_v7 = vadd.f32 %v103_v5, %v75_v6 }
  0x93   :  { %78 = vst [vmem:[#allocation7] sm:$0xff] %v76_v7 }
  0x94   :  { %89 = dma.vmem_to_hbm [thread:$0]  %s85_s25, 128, %s87_s28, [#allocation4]  }
  0x95   :  { %180 = dma.done.wait [#allocation4], 128  }
  0x96   :  { %181 = vsyncadd [#allocation4], 4294967168 }
  0x97   :  { %94 = vsyncpa [#allocation3], 1 }
  0x98   :  { %95 = vsyncpa [#allocation6], 1 }
  0x99   :  { %96 = vsyncpa [#allocation4], 1 }

</bundles_post_ra>
